<compile_context>
chip_gen: v6e
topology: v6e:2x2x1
jax: 0.10.0
libtpu: 0.0.40
codegen_flags: <defaults>
</compile_context>

<pallas_src>
import numpy as np
import jax
import jax.numpy as jnp
from jax import lax
from jax.experimental import pallas as pl
from jax.experimental.pallas import tpu as pltpu  # noqa: F401  (kept for TPU-specific tuning hooks)

# ----------------------- small, module-consistent sizes ---------------------
V  = 64    # decoder vocab size
H  = 32    # hidden size ("dimension", config.dimension == 'auto')
B  = 2     # batch
S  = 8     # input sequence length
D0 = 16    # AE reparametrized embedding width  (MLP_layers[0])
D1 = 32    # MLP hidden width
PAD_TOKEN_ID = 0

PREFIX_CONFIG = {
    "algoA": {"abs_pos": 0, "shift": 4},
    "algoB": {"abs_pos": 1, "shift": 4},
}


def _indexing(prefix_config):
    """Mirror of AlgorithmEmbeddingLayer._indexing: assign 'start' offsets."""
    id_to_tag = {v["abs_pos"]: k for k, v in prefix_config.items()}
    acc = 0
    info = {}
    for pos in sorted(id_to_tag):
        tag = id_to_tag[pos]
        info[tag] = {"start": acc, "shift": prefix_config[tag]["shift"]}
        acc += prefix_config[tag]["shift"]
    return info, acc          # (tag -> {start, shift}), total prefix rows P


# ----------------------------- fused Pallas kernel ---------------------------
def _fused_kernel(gidx_ref, table_ref, ae_ref, w1_ref, b1_ref, w2_ref, b2_ref,
                  out_ref):
    """Single launch: AE MLP + embedding gather + padded inputs_embeds assembly.

    gidx_ref : [N, 1] int32, N = B * MAX_LEN.
               gidx < V            -> vocab row (pad positions use PAD_TOKEN_ID)
               V <= gidx < V + P   -> AE tag row (gidx - V)
    table    : [V, H]  bf16 decoder input-embedding table.
    ae/w1/b1/w2/b2 : bf16 AE reparametrization (Linear - ReLU - Linear).
    out      : [N, H]  bf16 (flattened [B, MAX_LEN, H]).
    """
    vocab = table_ref.shape[0]
    p = ae_ref.shape[0]
    n = out_ref.shape[0]

    # --- AE MLP: tag = relu(E @ W1 + b1) @ W2 + b2   (bf16 MXU, f32 acc) -----
    h = jnp.dot(ae_ref[...], w1_ref[...], preferred_element_type=jnp.float32)
    h = jnp.maximum(h + b1_ref[...].astype(jnp.float32), 0.0)
    h = h.astype(jnp.bfloat16)                                      # AE is bf16
    t = jnp.dot(h, w2_ref[...], preferred_element_type=jnp.float32)
    tag = (t + b2_ref[...].astype(jnp.float32)).astype(jnp.bfloat16)  # [P, H]

    # --- row gather / padded assembly via exact one-hot MXU matmuls ----------
    ids = gidx_ref[...]                                             # [N, 1] i32
    oh_vocab = (ids == lax.broadcasted_iota(jnp.int32, (n, vocab), 1)
                ).astype(jnp.float32)                               # [N, V]
    oh_tag = ((ids - vocab) == lax.broadcasted_iota(jnp.int32, (n, p), 1)
              ).astype(jnp.float32)                                 # [N, P]
    out = jnp.dot(oh_vocab, table_ref[...].astype(jnp.float32),
                  preferred_element_type=jnp.float32)
    out = out + jnp.dot(oh_tag, tag.astype(jnp.float32),
                        preferred_element_type=jnp.float32)
    out_ref[...] = out.astype(jnp.bfloat16)


def fused_embed_assemble(table_bf16, ae, w1, b1, w2, b2, gidx_i32):
    """out[n] = table[gidx[n]] if gidx[n] < V else MLP(ae)[gidx[n] - V]."""
    n = gidx_i32.shape[0]
    h = table_bf16.shape[1]
    # Tiny operands (<8 KiB total): whole-array blocks, single grid step,
    # everything resident in VMEM. One launch replaces three.
    return pl.pallas_call(
        _fused_kernel,
        out_shape=jax.ShapeDtypeStruct((n, h), jnp.bfloat16),
    )(gidx_i32, table_bf16, ae, w1, b1, w2, b2)


# ------------------------------ forward glue ---------------------------------
def aicoder_forward(params, input_ids_np, attention_mask_np, tags, labels,
                    tag_info, P, position="prefix", tag_rep_scheme="full"):
    if position != "prefix" or tag_rep_scheme != "full":
        raise Exception("only position='prefix', tag_rep_scheme='full' implemented")

    bsz, seq = input_ids_np.shape
    vocab, hid = params["embed_table"].shape
    max_total = P + seq                  # static bucket -> kernel compiles once

    # ---- host-side index plumbing (vectorized numpy) ------------------------
    mask = np.asarray(attention_mask_np)
    lead = (np.cumsum(mask, axis=1) == 0).sum(axis=1).astype(np.int64)  # leading pads
    q_len = seq - lead
    total = P + q_len
    max_len = int(total.max())           # original (data-dependent) max length

    # tag attention masks ('full' scheme) — inherently host-side string handling
    tag_mask = np.zeros((bsz, P), dtype=np.int64)
    for bi, tag_set in enumerate(tags):
        for t in tag_set:
            st, sh = tag_info[t]["start"], tag_info[t]["shift"]
            tag_mask[bi, st:st + sh] = 1
    # TODO(synk): zero-length tag sets take the original's empty-embedding path
    # (variable per-row structure) and are not modelled here.

    # per row at static MAX_LEN: [lead pad rows | P tag rows | stripped question]
    tcol = np.arange(max_total)[None, :]
    lead_c = lead[:, None]
    rows = np.arange(bsz)[:, None]
    qcol = np.clip(tcol - P, 0, seq - 1)
    gidx = np.where(tcol < lead_c, PAD_TOKEN_ID,
                    np.where(tcol < lead_c + P, vocab + (tcol - lead_c),
                             input_ids_np[rows, qcol])).astype(np.int32)
    mask_full = np.where(
        tcol < lead_c, 0,
        np.where(tcol < lead_c + P,
                 tag_mask[rows, np.clip(tcol - lead_c, 0, P - 1)], 1)).astype(np.int64)

    # ---- the single fused Pallas launch --------------------------------------
    out = fused_embed_assemble(
        params["embed_table"], params["ae_embed"], params["w1"], params["b1"],
        params["w2"], params["b2"],
        jnp.asarray(gidx.reshape(bsz * max_total, 1)))
    padded_full = out.reshape(bsz, max_total, hid)          # [B, MAX_LEN, H] bf16

    # Recover the original dynamic-max_len semantics: every row has at least
    # (MAX_LEN - max_len) leading pad columns in the static layout, so slicing
    # them off reproduces _pad_input_embeds exactly.
    inputs_embeds = padded_full[:, max_total - max_len:, :]
    new_mask = jnp.asarray(mask_full[:, max_total - max_len:])

    # ---- _prepare_labels (ragged python lists) -------------------------------
    padded_labels = np.full((bsz, max_len), -100, dtype=np.int64)
    for bi, lab in enumerate(labels):
        padded_labels[bi, max_len - len(lab):] = np.asarray(lab, dtype=np.int64)

    # TODO(synk): decoder(inputs_embeds, attention_mask, labels) is the frozen
    # pretrained HF model; not translated.
    return inputs_embeds, new_mask, jnp.asarray(padded_labels)


# ----------------------------------- main ------------------------------------
if __name__ == "__main__":
    key = jax.random.PRNGKey(0)
    k_emb, k_ae, k_w1, k_b1, k_w2, k_b2, k_ids = jax.random.split(key, 7)

    tag_info, P = _indexing(PREFIX_CONFIG)             # P == 8

    params = {
        "embed_table": jax.random.normal(k_emb, (V, H), jnp.float32).astype(jnp.bfloat16),
        "ae_embed":    jax.random.normal(k_ae, (P, D0), jnp.float32).astype(jnp.bfloat16),
        "w1": (jax.random.normal(k_w1, (D0, D1), jnp.float32) / np.sqrt(D0)).astype(jnp.bfloat16),
        "b1": (0.01 * jax.random.normal(k_b1, (1, D1), jnp.float32)).astype(jnp.bfloat16),
        "w2": (jax.random.normal(k_w2, (D1, H), jnp.float32) / np.sqrt(D1)).astype(jnp.bfloat16),
        "b2": (0.01 * jax.random.normal(k_b2, (1, H), jnp.float32)).astype(jnp.bfloat16),
    }

    input_ids = np.asarray(jax.random.randint(k_ids, (B, S), 1, V, jnp.int32))
    attention_mask = np.array([[0, 0, 0, 1, 1, 1, 1, 1],
                               [0, 1, 1, 1, 1, 1, 1, 1]], dtype=np.int64)
    input_ids = np.where(attention_mask == 0, PAD_TOKEN_ID, input_ids)
    tags = [["algoA"], ["algoA", "algoB"]]
    labels = [list(map(int, row)) for row in input_ids]

    inputs_embeds, new_mask, padded_labels = aicoder_forward(
        params, input_ids, attention_mask, tags, labels, tag_info, P)
    jax.block_until_ready(inputs_embeds)
    jax.block_until_ready(new_mask)

    # ---------------------- pure-numpy reference check -----------------------
    def bf16_round(x):
        return np.asarray(jnp.asarray(x).astype(jnp.bfloat16).astype(jnp.float32))

    emb = np.asarray(params["embed_table"].astype(jnp.float32))
    ae  = np.asarray(params["ae_embed"].astype(jnp.float32))
    w1  = np.asarray(params["w1"].astype(jnp.float32))
    b1  = np.asarray(params["b1"].astype(jnp.float32))
    w2  = np.asarray(params["w2"].astype(jnp.float32))
    b2  = np.asarray(params["b2"].astype(jnp.float32))
    h_ref = bf16_round(np.maximum(ae @ w1 + b1, 0.0))
    tag_ref = bf16_round(h_ref @ w2 + b2)
    q_ref = emb[input_ids]                                           # [B, S, H]
    lead = [int((np.cumsum(r) == 0).sum()) for r in attention_mask]
    max_len = inputs_embeds.shape[1]
    ref = np.zeros((B, max_len, H), np.float32)
    for b in range(B):
        d = max_len - (P + S - lead[b])
        parts = [np.broadcast_to(emb[PAD_TOKEN_ID], (d, H)), tag_ref, q_ref[b, lead[b]:]]
        ref[b] = np.concatenate(parts, axis=0)
    got = np.asarray(inputs_embeds.astype(jnp.float32))
    np.testing.assert_allclose(got, ref, rtol=2e-2, atol=2e-2)

    # attention-mask / labels semantics check  (max_len == 15 for this batch)
    exp_mask0 = [0, 0] + [1, 1, 1, 1, 0, 0, 0, 0] + [1] * 5
    exp_mask1 = [1] * 15
    assert np.array_equal(np.asarray(new_mask), np.array([exp_mask0, exp_mask1]))
    pl_np = np.asarray(padded_labels)
    assert np.all(pl_np[:, :max_len - S] == -100)
    assert np.array_equal(pl_np[:, max_len - S:], input_ids.astype(pl_np.dtype))

    print("KERNEL_OK")
</pallas_src>

<mosaic_0001>
module attributes {stable_mosaic.version = 11 : i64} {
  func.func @_fused_kernel(%arg0: memref<32x1xi32, #tpu.memory_space<vmem>>, %arg1: memref<64x32xbf16, #tpu.memory_space<vmem>>, %arg2: memref<8x16xbf16, #tpu.memory_space<vmem>>, %arg3: memref<16x32xbf16, #tpu.memory_space<vmem>>, %arg4: memref<1x32xbf16, #tpu.memory_space<vmem>>, %arg5: memref<32x32xbf16, #tpu.memory_space<vmem>>, %arg6: memref<1x32xbf16, #tpu.memory_space<vmem>>, %arg7: memref<32x32xbf16, #tpu.memory_space<vmem>>) attributes {dimension_semantics = [], scalar_prefetch = 0 : i64, scratch_operands = 0 : i64, tpu.core_type = #tpu.core_type<tc>} {
    %c0 = arith.constant 0 : index
    %c0_0 = arith.constant 0 : index
    %0 = vector.load %arg2[%c0, %c0_0] : memref<8x16xbf16, #tpu.memory_space<vmem>>, vector<8x16xbf16>
    %c0_1 = arith.constant 0 : index
    %c0_2 = arith.constant 0 : index
    %1 = vector.load %arg3[%c0_1, %c0_2] : memref<16x32xbf16, #tpu.memory_space<vmem>>, vector<16x32xbf16>
    %cst = arith.constant dense<0.000000e+00> : vector<8x32xf32>
    %2 = tpu.matmul %0, %1, %cst {dimension_numbers = #tpu.dot_dimension_numbers<[1], [0], [0], [1], [0, 0, 1, 1], [], []>} : vector<8x16xbf16>, vector<16x32xbf16>, vector<8x32xf32> -> vector<8x32xf32>
    %c0_3 = arith.constant 0 : index
    %c0_4 = arith.constant 0 : index
    %3 = vector.load %arg4[%c0_3, %c0_4] : memref<1x32xbf16, #tpu.memory_space<vmem>>, vector<1x32xbf16>
    %4 = arith.extf %3 : vector<1x32xbf16> to vector<1x32xf32>
    %5 = vector.broadcast %4 : vector<1x32xf32> to vector<8x32xf32>
    %6 = arith.addf %2, %5 : vector<8x32xf32>
    %cst_5 = arith.constant 0.000000e+00 : f32
    %7 = vector.broadcast %cst_5 : f32 to vector<8x32xf32>
    %8 = arith.maximumf %6, %7 : vector<8x32xf32>
    %9 = arith.truncf %8 : vector<8x32xf32> to vector<8x32xbf16>
    %c0_6 = arith.constant 0 : index
    %c0_7 = arith.constant 0 : index
    %10 = vector.load %arg5[%c0_6, %c0_7] : memref<32x32xbf16, #tpu.memory_space<vmem>>, vector<32x32xbf16>
    %cst_8 = arith.constant dense<0.000000e+00> : vector<8x32xf32>
    %11 = tpu.matmul %9, %10, %cst_8 {dimension_numbers = #tpu.dot_dimension_numbers<[1], [0], [0], [1], [0, 0, 1, 1], [], []>} : vector<8x32xbf16>, vector<32x32xbf16>, vector<8x32xf32> -> vector<8x32xf32>
    %c0_9 = arith.constant 0 : index
    %c0_10 = arith.constant 0 : index
    %12 = vector.load %arg6[%c0_9, %c0_10] : memref<1x32xbf16, #tpu.memory_space<vmem>>, vector<1x32xbf16>
    %13 = arith.extf %12 : vector<1x32xbf16> to vector<1x32xf32>
    %14 = vector.broadcast %13 : vector<1x32xf32> to vector<8x32xf32>
    %15 = arith.addf %11, %14 : vector<8x32xf32>
    %16 = arith.truncf %15 : vector<8x32xf32> to vector<8x32xbf16>
    %c0_11 = arith.constant 0 : index
    %c0_12 = arith.constant 0 : index
    %17 = vector.load %arg0[%c0_11, %c0_12] : memref<32x1xi32, #tpu.memory_space<vmem>>, vector<32x1xi32>
    %18 = tpu.iota {dimensions = array<i32: 1>} : vector<32x64xi32>
    %19 = vector.broadcast %17 : vector<32x1xi32> to vector<32x64xi32>
    %20 = arith.cmpi eq, %19, %18 : vector<32x64xi32>
    %21 = arith.extui %20 : vector<32x64xi1> to vector<32x64xi32>
    %22 = arith.sitofp %21 : vector<32x64xi32> to vector<32x64xf32>
    %c64_i32 = arith.constant 64 : i32
    %23 = vector.broadcast %c64_i32 : i32 to vector<32x1xi32>
    %24 = arith.subi %17, %23 : vector<32x1xi32>
    %25 = tpu.iota {dimensions = array<i32: 1>} : vector<32x8xi32>
    %26 = vector.broadcast %24 : vector<32x1xi32> to vector<32x8xi32>
    %27 = arith.cmpi eq, %26, %25 : vector<32x8xi32>
    %28 = arith.extui %27 : vector<32x8xi1> to vector<32x8xi32>
    %29 = arith.sitofp %28 : vector<32x8xi32> to vector<32x8xf32>
    %c0_13 = arith.constant 0 : index
    %c0_14 = arith.constant 0 : index
    %30 = vector.load %arg1[%c0_13, %c0_14] : memref<64x32xbf16, #tpu.memory_space<vmem>>, vector<64x32xbf16>
    %31 = arith.extf %30 : vector<64x32xbf16> to vector<64x32xf32>
    %cst_15 = arith.constant dense<0.000000e+00> : vector<32x32xf32>
    %32 = tpu.matmul %22, %31, %cst_15 {dimension_numbers = #tpu.dot_dimension_numbers<[1], [0], [0], [1], [0, 0, 1, 1], [], []>} : vector<32x64xf32>, vector<64x32xf32>, vector<32x32xf32> -> vector<32x32xf32>
    %33 = arith.extf %16 : vector<8x32xbf16> to vector<8x32xf32>
    %cst_16 = arith.constant dense<0.000000e+00> : vector<32x32xf32>
    %34 = tpu.matmul %29, %33, %cst_16 {dimension_numbers = #tpu.dot_dimension_numbers<[1], [0], [0], [1], [0, 0, 1, 1], [], []>} : vector<32x8xf32>, vector<8x32xf32>, vector<32x32xf32> -> vector<32x32xf32>
    %35 = arith.addf %32, %34 : vector<32x32xf32>
    %36 = arith.truncf %35 : vector<32x32xf32> to vector<32x32xbf16>
    %c0_17 = arith.constant 0 : index
    %c0_18 = arith.constant 0 : index
    %37 = vector.load %arg7[%c0_17, %c0_18] : memref<32x32xbf16, #tpu.memory_space<vmem>>, vector<32x32xbf16>
    tpu.vector_store %arg7[%c0_17, %c0_18], %36 {strides = array<i32>} : memref<32x32xbf16, #tpu.memory_space<vmem>>, vector<32x32xbf16>,
    return
  }
}

</mosaic_0001>

<bundles_post_ra>
// kernel: tpu_custom_call.1
= control target key start
LH: loop header
LB: loop body
LE: loop exit
PB: predicated region body
PF: predicated region fallthrough
CT: control target
= control target key end

     0   :  { %v615_v1 = vmov 0.0   ;;  %vm616_vm0 = vmmov 0   ;;  %vm43_vm1 = vcmask 130048   ;;  %s741_s0 = inlined_call_operand.vmem [shape: s32[32,1], index: 0, kind: input, shape index: {}]   ;;  %s742_s1 = inlined_call_operand.vmem [shape: bf16[64,32], index: 1, kind: input, shape index: {}]   ;;  %s743_s2 = inlined_call_operand.vmem [shape: bf16[8,16], index: 2, kind: input, shape index: {}]   ;;  %s744_s3 = inlined_call_operand.vmem [shape: bf16[16,32], index: 3, kind: input, shape index: {}]   ;;  %s745_s4 = inlined_call_operand.vmem [shape: bf16[1,32], index: 4, kind: input, shape index: {}]   ;;  %s746_s5 = inlined_call_operand.vmem [shape: bf16[32,32], index: 5, kind: input, shape index: {}]   ;;  %s747_s6 = inlined_call_operand.vmem [shape: bf16[1,32], index: 6, kind: input, shape index: {}]   ;;  %s748_s7 = inlined_call_operand.hbm [shape: bf16[32,32], index: 7, kind: output, shape index: {}]  }
   0x1   :  { %v590_v0 = vld [vmem:[%s744_s3] sm:$0xff]   ;;  %538 = vmatprep.subr.bf16.mxu0 %v615_v1  ;;  %540 = vmatprep.mubr.msk.bf16.mxu0 %vm616_vm0, %v615_v1  ;;  %v591_v3 = vld [vmem:[%s746_s5 + $0x8] sm:$0xff]  }
   0x2   :  { %539 = vmatpush3.bf16.msra.mxu0 %v590_v0  ;;  %v28_v2 = vld [vmem:[%s743_s2] sm:$0xf] }
   0x3   :  { %544 = vmatprep.subr.bf16.mxu0 %v615_v1 }
   0x4   :  { %12 = vsyncpa [#allocation3], 0  ;;  %v592_v4 = vld [vmem:[%s746_s5] sm:$0xff]   ;;  %v157_v6 = vld [vmem:[%s741_s0 + $0x8] sm:$0xff]  ;;  %v617_v8 = vmov 0   ;;  %v33_v14 = vlaneseq  ;;  %vm111_vm2 = vcmask 261120  }
   0x5   :  { %541 = vmatmul.mubr.msk.bf16.vlgmr.msra.gmra.mxu0 %vm43_vm1, %v28_v2  ;;  %v156_v5 = vld [vmem:[%s741_s0] sm:$0xff]  ;;  %v158_v7 = vld [vmem:[%s741_s0 + $0x10] sm:$0xff]  ;;  %588 = vset.pattern.permute.xlu0 %v617_v8  ;;  %v159_v11 = vld [vmem:[%s741_s0 + $0x18] sm:$0xff]  ;;  %v474_v12 = vadd.s32 4294967232, %v157_v6  ;;  %vm231_vm4 = vcmask 64512   ;;  %vm329_vm9 = vcmask 523264  }
   0x6   :  { %545 = vmatpush3.bf16.msra.mxu0 %v591_v3  ;;  %548 = vmatprep.mubr.msk.bf16.mxu0 %vm616_vm0, %v615_v1  ;;  %v473_v9 = vadd.s32 4294967232, %v156_v5  ;;  %v475_v10 = vadd.s32 4294967232, %v158_v7  ;;  %v476_v13 = vadd.s32 4294967232, %v159_v11  ;;  %v34_v15 = vshrl.u32 %v33_v14, 7  ;;  %v31_v16 = vld [vmem:[%s745_s4] sm:$0x1] }
   0x7   :  { %546 = vmatprep.subr.bf16.mxu0 %v615_v1  ;;  %589 = vset.pattern.permute.xlu1 %v617_v8  ;;  %v32_v17 = vunpack.c.l.bf16 %v31_v16  ;;  %v693_v27 = vand.u32 127, %v33_v14  ;;  %v93_v30 = vld [vmem:[%s747_s6] sm:$0x1]  ;;  %v515_v37 = vld [vmem:[%s742_s1 + $0x18] sm:$0xff]   ;;  %v514_v45 = vld [vmem:[%s742_s1 + $0x10] sm:$0xff]   ;;  %vm443_vm13 = vcmask 257024  }
   0x8   :  { %191 = vperm.xlu0 %588, %v473_v9   ;;  %197 = vperm.xlu1 %589, %v475_v10   ;;  %v35_v18 = vsub.s32 0, %v34_v15  ;;  %v94_v31 = vunpack.c.l.bf16 %v93_v30  ;;  %v512_v42 = vunpack.c.h.bf16 %v515_v37  ;;  %v511_v47 = vunpack.c.l.bf16 %v515_v37  ;;  %v513_v52 = vld [vmem:[%s742_s1 + $0x8] sm:$0xff]   ;;  %v498_v56 = vld [vmem:[%s742_s1] sm:$0xff]   ;;  %s618_s1 = smov [#allocation2]  }
   0x9   :  { %v508_v50 = vunpack.c.h.bf16 %v514_v45  ;;  %v507_v53 = vunpack.c.l.bf16 %v514_v45  ;;  %v504_v55 = vunpack.c.h.bf16 %v513_v52  ;;  %v503_v57 = vunpack.c.l.bf16 %v513_v52  ;;  %s453_s23 = sshll.u32 %s618_s1, 4  ;;  %s454_s23 = int_to_ptr.vmem [resolvable:$true] %s453_s23 }
   0xa   :  { %547 = vmatpush3.bf16.msra.mxu0 %v592_v4  ;;  %v36_v19 = vrot.slane %v32_v17, %v35_v18  ;;  %v98_v32 = vrot.slane %v94_v31, %v35_v18  ;;  %v500_v59 = vunpack.c.h.bf16 %v498_v56  ;;  %v499_v61 = vunpack.c.l.bf16 %v498_v56  ;;  %s593_s24 = scalar_lea.vmem %s454_s23, 256  ;;  %p598_p1 = scmp.lt.s32.totalorder %s454_s23, %s454_s23 }
   0xb   :  { %p594_p0 = scmp.ne.s32.totalorder %s454_s23, %s593_s24  ;;  %p599_p2 = scmp.lt.s32.totalorder %s593_s24, %s593_s24 }
   0xc   :  { %194 = vperm.xlu0 %588, %v474_v12   ;;  %200 = vperm.xlu1 %589, %v476_v13  }
   0xd   :  { %p600_p3 = por %p599_p2, %p598_p1 }
   0xf   :  { %p601_p4 = pnand %p600_p3, %p594_p0 }
  0x10   :  { %163 = vperm.xlu0 %588, %v156_v5   ;;  %166 = vperm.xlu1 %589, %v157_v6  }
  0x14   :  { %169 = vperm.xlu0 %588, %v158_v7   ;;  %172 = vperm.xlu1 %589, %v159_v11  }
  0x83   :  { %v192_v28 = vpop.permute.xlu0 %191  ;;  %v198_v34 = vpop.permute.xlu1 %197 }
  0x84   :  { %vm202_vm3 = vcmp.eq.s32.totalorder %v192_v28, %v693_v27  ;;  %vm204_vm5 = vcmp.eq.s32.totalorder %v198_v34, %v693_v27 }
  0x85   :  { %v477_v29 = vsel %vm202_vm3, 1.0, %v615_v1  ;;  %v479_v46 = vsel %vm204_vm5, 1.0, %v615_v1 }
  0x86   :  { %554 = vmatprep.mubr.msk.f32.mxu1 %vm231_vm4, %v477_v29 }
  0x87   :  { %v195_v38 = vpop.permute.xlu0 %194  ;;  %v201_v43 = vpop.permute.xlu1 %200 }
  0x88   :  { %vm203_vm6 = vcmp.eq.s32.totalorder %v195_v38, %v693_v27  ;;  %vm205_vm7 = vcmp.eq.s32.totalorder %v201_v43, %v693_v27 }
  0x89   :  { %v478_v48 = vsel %vm203_vm6, 1.0, %v615_v1  ;;  %v480_v51 = vsel %vm205_vm7, 1.0, %v615_v1 }
  0x8b   :  { %v164_v49 = vpop.permute.xlu0 %163  ;;  %v167_v58 = vpop.permute.xlu1 %166 }
  0x8c   :  { %vm174_vm8 = vcmp.eq.s32.totalorder %v164_v49, %v693_v27  ;;  %vm175_vm10 = vcmp.eq.s32.totalorder %v167_v58, %v693_v27 }
  0x8d   :  { %v469_v54 = vsel %vm174_vm8, 1.0, %v615_v1  ;;  %v470_v63 = vsel %vm175_vm10, 1.0, %v615_v1 }
  0x8f   :  { %v170_v60 = vpop.permute.xlu0 %169  ;;  %v173_v62 = vpop.permute.xlu1 %172 }
  0x90   :  { %vm176_vm11 = vcmp.eq.s32.totalorder %v170_v60, %v693_v27  ;;  %vm177_vm12 = vcmp.eq.s32.totalorder %v173_v62, %v693_v27 }
  0x91   :  { %v471_v0 = vsel %vm176_vm11, 1.0, %v615_v1  ;;  %v472_v2 = vsel %vm177_vm12, 1.0, %v615_v1 }
  0xc5   :  { %v81_v20 = vpop.f32.mrf.mxu0 }
  0xc6   :  { %v82_v21 = vadd.f32 %v81_v20, %v36_v19 }
  0xc7   :  { %v542_v22 = vpop.f32.mrf.mxu0 }
  0xc8   :  { %v87_v23 = vmax.f32 %v82_v21, 0.0 }
  0xc9   :  { %v84_v24 = vpop.f32.mrf.mxu0 }
  0xca   :  { %v88_v25 = vpack.c.bf16 %v87_v23, %v87_v23 }
  0xcb   :  { %v543_v26 = vpop.f32.mrf.mxu0 }
  0xcc   :  { %549 = vmatmul.mubr.msk.bf16.vlgmr.msra.gmra.mxu0 %vm111_vm2, %v88_v25 }
 0x18c   :  { %v149_v33 = vpop.f32.mrf.mxu0 }
 0x18d   :  { %v150_v35 = vadd.f32 %v149_v33, %v98_v32 }
 0x18e   :  { %v550_v36 = vpop.f32.mrf.mxu0 }
 0x18f   :  { %v155_v39 = vpack.c.bf16 %v150_v35, %v150_v35 }
 0x190   :  { %v152_v40 = vpop.f32.mrf.mxu0 }
 0x191   :  { %v230_v41 = vunpack.c.l.bf16 %v155_v39 }
 0x192   :  { %v551_v44 = vpop.f32.mrf.mxu0 }
 0x193   :  { %552 = vmatprep.subr.mxu1 %v230_v41 }
 0x194   :  { %553 = vmatpush3.msra.mxu1 %v230_v41 }
 0x195   :  { %555 = vmatmul.mubr.msk.f32.vlgmr.msra.gmra.mxu1 %vm231_vm4, %v478_v48  ;;  %560 = vmatprep.subr.mxu1 %v512_v42 }
 0x196   :  { %561 = vmatpush3.msra.mxu1 %v512_v42  ;;  %557 = vmatprep.mubr.msk.f32.mxu1 %vm231_vm4, %v479_v46 }
 0x197   :  { %562 = vmatprep.subr.mxu1 %v511_v47 }
 0x198   :  { %563 = vmatpush3.msra.mxu1 %v511_v47 }
 0x199   :  { %558 = vmatmul.mubr.msk.f32.gmra.mxu1 %vm231_vm4, %v480_v51  ;;  %564 = vmatprep.subr.mxu1 %v508_v50 }
 0x19a   :  { %565 = vmatpush3.msra.mxu1 %v508_v50  ;;  %576 = vmatprep.mubr.msk.f32.mxu1 %vm329_vm9, %v469_v54 }
 0x19b   :  { %566 = vmatprep.subr.mxu1 %v507_v53 }
 0x19c   :  { %567 = vmatpush3.msra.mxu1 %v507_v53 }
 0x19d   :  { %568 = vmatprep.subr.mxu1 %v504_v55 }
 0x19e   :  { %569 = vmatpush3.msra.mxu1 %v504_v55 }
 0x19f   :  { %570 = vmatprep.subr.mxu1 %v503_v57 }
 0x1a0   :  { %571 = vmatpush3.msra.mxu1 %v503_v57 }
 0x1a1   :  { %572 = vmatprep.subr.mxu1 %v500_v59 }
 0x1a2   :  { %573 = vmatpush3.msra.mxu1 %v500_v59 }
 0x1a3   :  { %574 = vmatprep.subr.mxu1 %v499_v61 }
 0x1a4   :  { %575 = vmatpush3.msra.mxu1 %v499_v61 }
 0x1a5   :  { %577 = vmatmul.mubr.msk.f32.vlgmr.msra.gmra.mxu1 %vm329_vm9, %v470_v63 }
 0x1a6   :  { %579 = vmatprep.mubr.msk.f32.mxu1 %vm329_vm9, %v471_v0 }
 0x1a9   :  { %580 = vmatmul.mubr.msk.f32.gmra.mxu1 %vm329_vm9, %v472_v2 }
 0x255   :  { %v556_v3 = vpop.f32.mrf.mxu1 }
 0x257   :  { %v310_v4 = vpop.f32.mrf.mxu1 }
 0x259   :  { %v559_v5 = vpop.f32.mrf.mxu1 }
 0x25b   :  { %v320_v6 = vpop.f32.mrf.mxu1 }
 0x265   :  { %v578_v7 = vpop.f32.mrf.mxu1 }
 0x266   :  { %v414_v8 = vadd.f32 %v578_v7, %v556_v3 }
 0x267   :  { %v408_v9 = vpop.f32.mrf.mxu1 }
 0x268   :  { %v494_v10 = vpack.c.bf16 %v414_v8, %v414_v8  ;;  %v409_v11 = vadd.f32 %v408_v9, %v310_v4 }
 0x269   :  { %v581_v12 = vpop.f32.mrf.mxu1 }
 0x26a   :  { %445 = vst.msk [vmem:[#allocation2 + $0x4] sm:$0xf] %vm443_vm13, %v494_v10  ;;  %v493_v13 = vpack.c.bf16 %v409_v11, %v409_v11  ;;  %v424_v14 = vadd.f32 %v581_v12, %v559_v5 }
 0x26b   :  { %v418_v1 = vpop.f32.mrf.mxu1 }
 0x26c   :  { %444 = vst.msk [vmem:[#allocation2] sm:$0xf] %vm443_vm13, %v493_v13  ;;  %v496_v15 = vpack.c.bf16 %v424_v14, %v424_v14  ;;  %v419_v16 = vadd.f32 %v418_v1, %v320_v6 }
 0x26e   :  { %447 = vst.msk [vmem:[#allocation2 + $0xc] sm:$0xf] %vm443_vm13, %v496_v15  ;;  %v495_v17 = vpack.c.bf16 %v419_v16, %v419_v16 }
 0x270   :  { %446 = vst.msk [vmem:[#allocation2 + $0x8] sm:$0xf] %vm443_vm13, %v495_v17 }
 0x271   :  { %604 = shalt.err (!%p601_p4)
}
 0x272   :  { %s619_s25 = smov 64   ;;  %s620_s26 = smov 4  }
 0x273   :  { %459 = dma.vmem_to_hbm [thread:$0]  %s454_s23, 256, %s748_s7, [#allocation3], %s619_s25, %s619_s25, %s620_s26  }
 0x274   :  { %613 = dma.done.wait [#allocation3], 256  }
 0x275   :  { %614 = vsyncadd [#allocation3], 4294967040 }
 0x276   :  { %463 = vsyncpa [#allocation3], 1 }

</bundles_post_ra>
